<compile_context>
chip_gen: v6e
topology: v6e:2x2x1
jax: 0.10.0
libtpu: 0.0.40
codegen_flags: <defaults>
</compile_context>

<pallas_src>
import functools

import jax
import jax.numpy as jnp
import numpy as np
from jax import lax
from jax.experimental import pallas as pl
from jax.experimental.pallas import tpu as pltpu

_LN_EPS = 1e-5
_INV_SQRT2 = np.float32(1.0 / np.sqrt(2.0))


# ----------------------------- block-size helpers -----------------------------

def _pick_row_block(r, cap=512):
    """Largest row block: whole array if small, else the biggest divisor of r that is a
    multiple of 8 and <= cap. Divisor => no partial blocks; big blocks amortize the
    ~0.35us/step pipeline overhead (measured 29% -> 85% of HBM roofline going 128->512)."""
    if r <= cap:
        return r
    for d in range(cap, 7, -1):
        if d % 8 == 0 and r % d == 0:
            return d
    return r  # fall back: single full block


def _pick_window_block(bw, cap=32):
    """Batch as many windows per attention grid step as possible while keeping >=2 grid
    steps when bw allows (helps v7x 2-TC sharding) and dividing bw exactly."""
    hi = min(cap, bw if bw < 2 else max(1, bw // 2))
    for d in range(hi, 0, -1):
        if bw % d == 0:
            return d
    return 1


# ----------------------------- Pallas kernels -----------------------------

def _ln_linear_kernel(x_ref, g_ref, b_ref, w_ref, wb_ref, o_ref):
    # fused LayerNorm + linear projection (used for the q branch)
    x = x_ref[...]
    xf = x.astype(jnp.float32)
    mu = jnp.mean(xf, axis=-1, keepdims=True)
    var = jnp.mean((xf - mu) ** 2, axis=-1, keepdims=True)
    xn = (xf - mu) * lax.rsqrt(var + _LN_EPS) * g_ref[...] + b_ref[...]
    xn = xn.astype(x.dtype)  # keep MXU operands in input dtype (bf16-native path)
    acc = jnp.dot(xn, w_ref[...], preferred_element_type=jnp.float32)
    o_ref[...] = (acc + wb_ref[...]).astype(o_ref.dtype)


def _ln_kv_kernel(x_ref, g_ref, b_ref, wk_ref, wv_ref, bk_ref, bv_ref, k_ref, v_ref):
    # fused LayerNorm + kv projection; emits k and v as two outputs (no XLA slice).
    x = x_ref[...]
    xf = x.astype(jnp.float32)
    mu = jnp.mean(xf, axis=-1, keepdims=True)
    var = jnp.mean((xf - mu) ** 2, axis=-1, keepdims=True)
    xn = (xf - mu) * lax.rsqrt(var + _LN_EPS) * g_ref[...] + b_ref[...]
    xn = xn.astype(x.dtype)
    k_acc = jnp.dot(xn, wk_ref[...], preferred_element_type=jnp.float32)
    v_acc = jnp.dot(xn, wv_ref[...], preferred_element_type=jnp.float32)
    k_ref[...] = (k_acc + bk_ref[...]).astype(k_ref.dtype)
    v_ref[...] = (v_acc + bv_ref[...]).astype(v_ref.dtype)


def _proj_add_kernel(x_ref, w_ref, b_ref, s_ref, o_ref):
    # output projection fused with residual add
    acc = jnp.dot(x_ref[...], w_ref[...], preferred_element_type=jnp.float32)
    o_ref[...] = (acc + b_ref[...] + s_ref[...].astype(jnp.float32)).astype(o_ref.dtype)


def _ln_mlp_res_kernel(x_ref, g_ref, b_ref, w1_ref, b1_ref, w2_ref, b2_ref, o_ref):
    # fused norm2 + MLP (fc1 -> exact GELU -> fc2) + residual add
    x = x_ref[...]
    xf = x.astype(jnp.float32)
    mu = jnp.mean(xf, axis=-1, keepdims=True)
    var = jnp.mean((xf - mu) ** 2, axis=-1, keepdims=True)
    xn = (xf - mu) * lax.rsqrt(var + _LN_EPS) * g_ref[...] + b_ref[...]
    xn = xn.astype(x.dtype)
    h = jnp.dot(xn, w1_ref[...], preferred_element_type=jnp.float32) + b1_ref[...]
    h = 0.5 * h * (1.0 + lax.erf(h * _INV_SQRT2))  # exact (erf) GELU, matches nn.GELU
    h = h.astype(w2_ref.dtype)
    o = jnp.dot(h, w2_ref[...], preferred_element_type=jnp.float32) + b2_ref[...]
    o_ref[...] = (xf + o).astype(o_ref.dtype)


def _attn_kernel(q_ref, k_ref, v_ref, bias_ref, o_ref, *, num_heads, head_dim, scale):
    # q_ref: (W, nq, c)  k_ref/v_ref: (W, n, c)  bias_ref: (nh, nq, n)  o_ref: (W, nq, c)
    # W windows per grid step; heads unrolled (small), windows batched in dot_general.
    q = q_ref[...] * scale           # scale whole tile once (not per head)
    k = k_ref[...]
    v = v_ref[...]
    for hh in range(num_heads):
        sl = slice(hh * head_dim, (hh + 1) * head_dim)
        qh = q[:, :, sl]
        kh = k[:, :, sl]
        vh = v[:, :, sl]
        s = lax.dot_general(qh, kh, (((2,), (2,)), ((0,), (0,))),
                            preferred_element_type=jnp.float32)        # (W, nq, n)
        s = s + bias_ref[hh]
        s = s - jnp.max(s, axis=-1, keepdims=True)
        p = jnp.exp(s)
        p = p * pl.reciprocal(jnp.sum(p, axis=-1, keepdims=True), approx=True)
        pv = lax.dot_general(p.astype(vh.dtype), vh, (((2,), (1,)), ((0,), (0,))),
                             preferred_element_type=jnp.float32)       # (W, nq, d)
        o_ref[:, :, sl] = pv.astype(o_ref.dtype)


# ----------------------------- Pallas wrappers -----------------------------

def ln_linear(x, g, b, w, wb):
    r, c = x.shape
    n = w.shape[1]
    br = _pick_row_block(r)
    return pl.pallas_call(
        _ln_linear_kernel,
        out_shape=jax.ShapeDtypeStruct((r, n), x.dtype),
        grid=(r // br,),
        in_specs=[pl.BlockSpec((br, c), lambda i: (i, 0)),
                  pl.BlockSpec((1, c), lambda i: (0, 0)),
                  pl.BlockSpec((1, c), lambda i: (0, 0)),
                  pl.BlockSpec((c, n), lambda i: (0, 0)),
                  pl.BlockSpec((1, n), lambda i: (0, 0))],
        out_specs=pl.BlockSpec((br, n), lambda i: (i, 0)),
        compiler_params=pltpu.CompilerParams(dimension_semantics=("parallel",)),
    )(x, g.reshape(1, c), b.reshape(1, c), w, wb.reshape(1, n))


def ln_kv(x, g, b, wk, wv, bk, bv):
    r, c = x.shape
    n = wk.shape[1]
    br = _pick_row_block(r)
    return pl.pallas_call(
        _ln_kv_kernel,
        out_shape=(jax.ShapeDtypeStruct((r, n), x.dtype),
                   jax.ShapeDtypeStruct((r, n), x.dtype)),
        grid=(r // br,),
        in_specs=[pl.BlockSpec((br, c), lambda i: (i, 0)),
                  pl.BlockSpec((1, c), lambda i: (0, 0)),
                  pl.BlockSpec((1, c), lambda i: (0, 0)),
                  pl.BlockSpec((c, n), lambda i: (0, 0)),
                  pl.BlockSpec((c, n), lambda i: (0, 0)),
                  pl.BlockSpec((1, n), lambda i: (0, 0)),
                  pl.BlockSpec((1, n), lambda i: (0, 0))],
        out_specs=(pl.BlockSpec((br, n), lambda i: (i, 0)),
                   pl.BlockSpec((br, n), lambda i: (i, 0))),
        compiler_params=pltpu.CompilerParams(dimension_semantics=("parallel",)),
    )(x, g.reshape(1, c), b.reshape(1, c), wk, wv, bk.reshape(1, n), bv.reshape(1, n))


def proj_add(x, w, b, shortcut):
    r, k = x.shape
    n = w.shape[1]
    br = _pick_row_block(r)
    return pl.pallas_call(
        _proj_add_kernel,
        out_shape=jax.ShapeDtypeStruct((r, n), x.dtype),
        grid=(r // br,),
        in_specs=[pl.BlockSpec((br, k), lambda i: (i, 0)),
                  pl.BlockSpec((k, n), lambda i: (0, 0)),
                  pl.BlockSpec((1, n), lambda i: (0, 0)),
                  pl.BlockSpec((br, n), lambda i: (i, 0))],
        out_specs=pl.BlockSpec((br, n), lambda i: (i, 0)),
        compiler_params=pltpu.CompilerParams(dimension_semantics=("parallel",)),
    )(x, w, b.reshape(1, n), shortcut)


def ln_mlp_res(x, g, b, w1, b1, w2, b2):
    r, c = x.shape
    hid = w1.shape[1]
    br = _pick_row_block(r)
    return pl.pallas_call(
        _ln_mlp_res_kernel,
        out_shape=jax.ShapeDtypeStruct((r, c), x.dtype),
        grid=(r // br,),
        in_specs=[pl.BlockSpec((br, c), lambda i: (i, 0)),
                  pl.BlockSpec((1, c), lambda i: (0, 0)),
                  pl.BlockSpec((1, c), lambda i: (0, 0)),
                  pl.BlockSpec((c, hid), lambda i: (0, 0)),
                  pl.BlockSpec((1, hid), lambda i: (0, 0)),
                  pl.BlockSpec((hid, c), lambda i: (0, 0)),
                  pl.BlockSpec((1, c), lambda i: (0, 0))],
        out_specs=pl.BlockSpec((br, c), lambda i: (i, 0)),
        compiler_params=pltpu.CompilerParams(dimension_semantics=("parallel",)),
    )(x, g.reshape(1, c), b.reshape(1, c), w1, b1.reshape(1, hid), w2, b2.reshape(1, c))


def window_attention(q_win, k_win, v_win, bias, num_heads, scale):
    bw, nq, c = q_win.shape
    _, n, _ = k_win.shape
    head_dim = c // num_heads
    wblk = _pick_window_block(bw)
    kernel = functools.partial(_attn_kernel, num_heads=num_heads,
                               head_dim=head_dim, scale=scale)
    return pl.pallas_call(
        kernel,
        out_shape=jax.ShapeDtypeStruct((bw, nq, c), q_win.dtype),
        grid=(bw // wblk,),
        in_specs=[pl.BlockSpec((wblk, nq, c), lambda i: (i, 0, 0)),
                  pl.BlockSpec((wblk, n, c), lambda i: (i, 0, 0)),
                  pl.BlockSpec((wblk, n, c), lambda i: (i, 0, 0)),
                  pl.BlockSpec((num_heads, nq, n), lambda i: (0, 0, 0))],
        out_specs=pl.BlockSpec((wblk, nq, c), lambda i: (i, 0, 0)),
        compiler_params=pltpu.CompilerParams(dimension_semantics=("parallel",)),
    )(q_win, k_win, v_win, bias)


# ----------------------------- pure-JAX reference primitives -----------------------------

def _ln_ref(x, g, b):
    mu = jnp.mean(x, -1, keepdims=True)
    var = jnp.mean((x - mu) ** 2, -1, keepdims=True)
    return (x - mu) * lax.rsqrt(var + _LN_EPS) * g + b


def ln_linear_ref(x, g, b, w, wb):
    return _ln_ref(x, g, b) @ w + wb


def ln_kv_ref(x, g, b, wk, wv, bk, bv):
    xn = _ln_ref(x, g, b)
    return xn @ wk + bk, xn @ wv + bv


def proj_add_ref(x, w, b, s):
    return x @ w + b + s


def ln_mlp_res_ref(x, g, b, w1, b1, w2, b2):
    xn = _ln_ref(x, g, b)
    h = xn @ w1 + b1
    h = 0.5 * h * (1.0 + lax.erf(h * _INV_SQRT2))
    return x + (h @ w2 + b2)


def attn_ref(q_win, k_win, v_win, bias, num_heads, scale):
    bw, nq, c = q_win.shape
    _, n, _ = k_win.shape
    d = c // num_heads
    q = q_win.reshape(bw, nq, num_heads, d).transpose(0, 2, 1, 3) * scale
    k = k_win.reshape(bw, n, num_heads, d).transpose(0, 2, 1, 3)
    v = v_win.reshape(bw, n, num_heads, d).transpose(0, 2, 1, 3)
    a = jnp.einsum('bhqd,bhkd->bhqk', q, k) + bias[None]
    a = jax.nn.softmax(a, axis=-1)
    o = jnp.einsum('bhqk,bhkd->bhqd', a, v)
    return o.transpose(0, 2, 1, 3).reshape(bw, nq, c)


# ----------------------------- SpaTB forward -----------------------------

def spatb_forward(params, x, y, x_size, rel_bias, cfg, use_pallas=True):
    h, w = x_size
    b, L, c = x.shape
    ws, ows = cfg['window_size'], cfg['overlap_win_size']
    nh, scale = cfg['num_heads'], cfg['scale']
    nwh, nww = h // ws, w // ws
    nw = nwh * nww

    # split of the kv weight (weights only; k/v activations come out as separate outputs)
    wk, wv = params['kv_w'][:, :c], params['kv_w'][:, c:]
    bk, bv = params['kv_b'][:c], params['kv_b'][c:]

    x2 = x.reshape(b * L, c)          # residual shortcut (raw x)
    y2 = y.reshape(b * L, c)

    if use_pallas:
        k_flat, v_flat = ln_kv(x2, params['norm1_g'], params['norm1_b'], wk, wv, bk, bv)
        q_flat = ln_linear(y2, params['norm1_g'], params['norm1_b'],
                           params['q_w'], params['q_b'])
    else:
        k_flat, v_flat = ln_kv_ref(x2, params['norm1_g'], params['norm1_b'], wk, wv, bk, bv)
        q_flat = ln_linear_ref(y2, params['norm1_g'], params['norm1_b'],
                               params['q_w'], params['q_b'])

    k_map = k_flat.reshape(b, h, w, c)
    v_map = v_flat.reshape(b, h, w, c)
    q_map = q_flat.reshape(b, h, w, c)

    # window_partition on q -> (b*nw, ws*ws, c)
    q_win = (q_map.reshape(b, nwh, ws, nww, ws, c)
             .transpose(0, 1, 3, 2, 4, 5)
             .reshape(b * nw, ws * ws, c))

    # nn.Unfold(kernel=ows, stride=ws, padding=(ows-ws)//2) on k/v maps (zero padding),
    # matching 'b (nc ch owh oww) nw -> nc (b nw) (owh oww) ch'.
    # TODO(synk): this im2col is still XLA glue (materializes ~(ows/ws)^2 x duplicated k/v);
    # next step is DMA-ing each (ows,ows,c) patch from the padded NHWC map inside the
    # attention kernel (memory_space=pl.ANY + pltpu.make_async_copy).
    pad = (ows - ws) // 2

    def unfold_nhwc(m):
        mp = jnp.pad(m, ((0, 0), (pad, pad), (pad, pad), (0, 0)))
        patches = []
        for wi in range(nwh):
            for wj in range(nww):
                patches.append(lax.slice(mp, (0, wi * ws, wj * ws, 0),
                                         (b, wi * ws + ows, wj * ws + ows, c)))
        p = jnp.stack(patches, axis=1)                 # (b, nw, ows, ows, c)
        return p.reshape(b * nw, ows * ows, c)

    k_win = unfold_nhwc(k_map)
    v_win = unfold_nhwc(v_map)

    attn = window_attention if use_pallas else attn_ref
    attn_out = attn(q_win, k_win, v_win, rel_bias, nh, scale)   # (b*nw, ws*ws, c)

    # window_reverse
    x_attn = (attn_out.reshape(b, nwh, nww, ws, ws, c)
              .transpose(0, 1, 3, 2, 4, 5)
              .reshape(b * L, c))

    if use_pallas:
        x1 = proj_add(x_attn, params['proj_w'], params['proj_b'], x2)
        out = ln_mlp_res(x1, params['norm2_g'], params['norm2_b'],
                         params['fc1_w'], params['fc1_b'],
                         params['fc2_w'], params['fc2_b'])
    else:
        x1 = proj_add_ref(x_attn, params['proj_w'], params['proj_b'], x2)
        out = ln_mlp_res_ref(x1, params['norm2_g'], params['norm2_b'],
                             params['fc1_w'], params['fc1_b'],
                             params['fc2_w'], params['fc2_b'])
    # DropPath / Dropout are identity in eval mode (training=False); no-ops here.
    return out.reshape(b, L, c)


# ----------------------------- parameters / rpi / bias construction -----------------------------

def init_params(key, dim, num_heads, window_size, overlap_win_size, mlp_ratio=4):
    hidden = int(dim * mlp_ratio)
    ks = jax.random.split(key, 12)
    table_len = (window_size + overlap_win_size - 1) ** 2

    def w_init(k, shape, std=0.02):
        return jax.random.normal(k, shape, jnp.float32) * std

    return dict(
        norm1_g=jnp.ones((dim,), jnp.float32), norm1_b=jnp.zeros((dim,), jnp.float32),
        norm2_g=jnp.ones((dim,), jnp.float32), norm2_b=jnp.zeros((dim,), jnp.float32),
        kv_w=w_init(ks[0], (dim, 2 * dim)), kv_b=w_init(ks[1], (2 * dim,)),
        q_w=w_init(ks[2], (dim, dim)), q_b=w_init(ks[3], (dim,)),
        proj_w=w_init(ks[4], (dim, dim)), proj_b=w_init(ks[5], (dim,)),
        fc1_w=w_init(ks[6], (dim, hidden)), fc1_b=w_init(ks[7], (hidden,)),
        fc2_w=w_init(ks[8], (hidden, dim)), fc2_b=w_init(ks[9], (dim,)),
        rpb_table=w_init(ks[10], (table_len, num_heads)),
    )


def calc_rpi_oca(window_size, overlap_win_size):
    ws, ows = window_size, overlap_win_size
    cq = jnp.stack(jnp.meshgrid(jnp.arange(ws), jnp.arange(ws), indexing='ij'), 0).reshape(2, -1)
    ck = jnp.stack(jnp.meshgrid(jnp.arange(ows), jnp.arange(ows), indexing='ij'), 0).reshape(2, -1)
    rel = cq[:, :, None] - ck[:, None, :] + (ows - 1)
    rpi = rel[0] * (ws + ows - 1) + rel[1]
    return rpi.astype(jnp.int32)


def build_rel_pos_bias(rpb_table, rpi, window_size, overlap_win_size):
    # constant per configuration -> computed once, not per forward call
    ws, ows = window_size, overlap_win_size
    bias = rpb_table[rpi.reshape(-1)].reshape(ws * ws, ows * ows, -1)
    return jnp.transpose(bias, (2, 0, 1))              # (nh, ws*ws, ows*ows)


# ----------------------------- main -----------------------------

if __name__ == "__main__":
    dim, num_heads, window_size, overlap_ratio, mlp_ratio = 16, 2, 4, 0.5, 4
    b, h, w = 2, 8, 8
    ows = int(window_size * overlap_ratio) + window_size   # 6
    cfg = dict(window_size=window_size, overlap_win_size=ows, num_heads=num_heads,
               scale=(dim // num_heads) ** (-0.5))

    key = jax.random.PRNGKey(0)
    kp, kx, ky = jax.random.split(key, 3)
    params = init_params(kp, dim, num_heads, window_size, ows, mlp_ratio)
    x = jax.random.normal(kx, (b, h * w, dim), jnp.float32)
    y = jax.random.normal(ky, (b, h * w, dim), jnp.float32)

    rpi = calc_rpi_oca(window_size, ows)                            # (16, 36)
    rel_bias = build_rel_pos_bias(params['rpb_table'], rpi, window_size, ows)  # (2, 16, 36)
    rel_bias = jax.block_until_ready(rel_bias)

    out = spatb_forward(params, x, y, (h, w), rel_bias, cfg, use_pallas=True)
    out = jax.block_until_ready(out)

    ref = spatb_forward(params, x, y, (h, w), rel_bias, cfg, use_pallas=False)
    ref = jax.block_until_ready(ref)

    # slightly looser tolerance than before because the Pallas softmax uses the EUP
    # approximate reciprocal (pl.reciprocal(approx=True)).
    np.testing.assert_allclose(np.asarray(out), np.asarray(ref), rtol=2e-3, atol=2e-3)

    print("KERNEL_OK")
</pallas_src>

<mosaic_0001>
module attributes {stable_mosaic.version = 11 : i64} {
  func.func @_ln_kv_kernel(%arg0: i32, %arg1: memref<128x16xf32, #tpu.memory_space<vmem>>, %arg2: memref<1x16xf32, #tpu.memory_space<vmem>>, %arg3: memref<1x16xf32, #tpu.memory_space<vmem>>, %arg4: memref<16x16xf32, #tpu.memory_space<vmem>>, %arg5: memref<16x16xf32, #tpu.memory_space<vmem>>, %arg6: memref<1x16xf32, #tpu.memory_space<vmem>>, %arg7: memref<1x16xf32, #tpu.memory_space<vmem>>, %arg8: memref<128x16xf32, #tpu.memory_space<vmem>>, %arg9: memref<128x16xf32, #tpu.memory_space<vmem>>) attributes {dimension_semantics = [#tpu.dimension_semantics<parallel>], iteration_bounds = array<i64: 1>, scalar_prefetch = 0 : i64, scratch_operands = 0 : i64, tpu.core_type = #tpu.core_type<tc>, window_params = [{transform_indices = @transform_0, window_bounds = array<i64: 128, 16>}, {pipeline_mode = #tpu.pipeline_mode<synchronous>, transform_indices = @transform_1, window_bounds = array<i64: 1, 16>}, {pipeline_mode = #tpu.pipeline_mode<synchronous>, transform_indices = @transform_2, window_bounds = array<i64: 1, 16>}, {pipeline_mode = #tpu.pipeline_mode<synchronous>, transform_indices = @transform_3, window_bounds = array<i64: 16, 16>}, {pipeline_mode = #tpu.pipeline_mode<synchronous>, transform_indices = @transform_4, window_bounds = array<i64: 16, 16>}, {pipeline_mode = #tpu.pipeline_mode<synchronous>, transform_indices = @transform_5, window_bounds = array<i64: 1, 16>}, {pipeline_mode = #tpu.pipeline_mode<synchronous>, transform_indices = @transform_6, window_bounds = array<i64: 1, 16>}, {transform_indices = @transform_7, window_bounds = array<i64: 128, 16>}, {transform_indices = @transform_8, window_bounds = array<i64: 128, 16>}]} {
    %c0 = arith.constant 0 : index
    %c0_0 = arith.constant 0 : index
    %0 = vector.load %arg1[%c0, %c0_0] : memref<128x16xf32, #tpu.memory_space<vmem>>, vector<128x16xf32>
    %cst = arith.constant dense<0.000000e+00> : vector<128xf32>
    %1 = vector.multi_reduction <add>, %0, %cst [1] : vector<128x16xf32> to vector<128xf32>
    %2 = vector.shape_cast %1 : vector<128xf32> to vector<128x1xf32>
    %cst_1 = arith.constant 1.600000e+01 : f32
    %3 = vector.broadcast %cst_1 : f32 to vector<128x1xf32>
    %4 = arith.divf %2, %3 : vector<128x1xf32>
    %5 = vector.broadcast %4 : vector<128x1xf32> to vector<128x16xf32>
    %6 = arith.subf %0, %5 : vector<128x16xf32>
    %7 = arith.mulf %6, %6 : vector<128x16xf32>
    %cst_2 = arith.constant dense<0.000000e+00> : vector<128xf32>
    %8 = vector.multi_reduction <add>, %7, %cst_2 [1] : vector<128x16xf32> to vector<128xf32>
    %9 = vector.shape_cast %8 : vector<128xf32> to vector<128x1xf32>
    %cst_3 = arith.constant 1.600000e+01 : f32
    %10 = vector.broadcast %cst_3 : f32 to vector<128x1xf32>
    %11 = arith.divf %9, %10 : vector<128x1xf32>
    %12 = vector.broadcast %4 : vector<128x1xf32> to vector<128x16xf32>
    %13 = arith.subf %0, %12 : vector<128x16xf32>
    %cst_4 = arith.constant 9.99999974E-6 : f32
    %14 = vector.broadcast %cst_4 : f32 to vector<128x1xf32>
    %15 = arith.addf %11, %14 : vector<128x1xf32>
    %16 = math.rsqrt %15 : vector<128x1xf32>
    %17 = vector.broadcast %16 : vector<128x1xf32> to vector<128x16xf32>
    %18 = arith.mulf %13, %17 : vector<128x16xf32>
    %c0_5 = arith.constant 0 : index
    %c0_6 = arith.constant 0 : index
    %19 = vector.load %arg2[%c0_5, %c0_6] : memref<1x16xf32, #tpu.memory_space<vmem>>, vector<1x16xf32>
    %20 = vector.broadcast %19 : vector<1x16xf32> to vector<128x16xf32>
    %21 = arith.mulf %18, %20 : vector<128x16xf32>
    %c0_7 = arith.constant 0 : index
    %c0_8 = arith.constant 0 : index
    %22 = vector.load %arg3[%c0_7, %c0_8] : memref<1x16xf32, #tpu.memory_space<vmem>>, vector<1x16xf32>
    %23 = vector.broadcast %22 : vector<1x16xf32> to vector<128x16xf32>
    %24 = arith.addf %21, %23 : vector<128x16xf32>
    %c0_9 = arith.constant 0 : index
    %c0_10 = arith.constant 0 : index
    %25 = vector.load %arg4[%c0_9, %c0_10] : memref<16x16xf32, #tpu.memory_space<vmem>>, vector<16x16xf32>
    %cst_11 = arith.constant dense<0.000000e+00> : vector<128x16xf32>
    %26 = tpu.matmul %24, %25, %cst_11 {dimension_numbers = #tpu.dot_dimension_numbers<[1], [0], [0], [1], [0, 0, 1, 1], [], []>} : vector<128x16xf32>, vector<16x16xf32>, vector<128x16xf32> -> vector<128x16xf32>
    %c0_12 = arith.constant 0 : index
    %c0_13 = arith.constant 0 : index
    %27 = vector.load %arg5[%c0_12, %c0_13] : memref<16x16xf32, #tpu.memory_space<vmem>>, vector<16x16xf32>
    %cst_14 = arith.constant dense<0.000000e+00> : vector<128x16xf32>
    %28 = tpu.matmul %24, %27, %cst_14 {dimension_numbers = #tpu.dot_dimension_numbers<[1], [0], [0], [1], [0, 0, 1, 1], [], []>} : vector<128x16xf32>, vector<16x16xf32>, vector<128x16xf32> -> vector<128x16xf32>
    %c0_15 = arith.constant 0 : index
    %c0_16 = arith.constant 0 : index
    %29 = vector.load %arg6[%c0_15, %c0_16] : memref<1x16xf32, #tpu.memory_space<vmem>>, vector<1x16xf32>
    %30 = vector.broadcast %29 : vector<1x16xf32> to vector<128x16xf32>
    %31 = arith.addf %26, %30 : vector<128x16xf32>
    %c0_17 = arith.constant 0 : index
    %c0_18 = arith.constant 0 : index
    %32 = vector.load %arg8[%c0_17, %c0_18] : memref<128x16xf32, #tpu.memory_space<vmem>>, vector<128x16xf32>
    tpu.vector_store %arg8[%c0_17, %c0_18], %31 {strides = array<i32>} : memref<128x16xf32, #tpu.memory_space<vmem>>, vector<128x16xf32>,
    %c0_19 = arith.constant 0 : index
    %c0_20 = arith.constant 0 : index
    %33 = vector.load %arg7[%c0_19, %c0_20] : memref<1x16xf32, #tpu.memory_space<vmem>>, vector<1x16xf32>
    %34 = vector.broadcast %33 : vector<1x16xf32> to vector<128x16xf32>
    %35 = arith.addf %28, %34 : vector<128x16xf32>
    %c0_21 = arith.constant 0 : index
    %c0_22 = arith.constant 0 : index
    %36 = vector.load %arg9[%c0_21, %c0_22] : memref<128x16xf32, #tpu.memory_space<vmem>>, vector<128x16xf32>
    tpu.vector_store %arg9[%c0_21, %c0_22], %35 {strides = array<i32>} : memref<128x16xf32, #tpu.memory_space<vmem>>, vector<128x16xf32>,
    return
  }
  func.func @transform_0(%arg0: i32) -> (i32, i32) {
    %c0_i32 = arith.constant 0 : i32
    %c0_i32_0 = arith.constant 0 : i32
    return %arg0, %c0_i32 : i32, i32
  }
  func.func @transform_1(%arg0: i32) -> (i32, i32) {
    %c0_i32 = arith.constant 0 : i32
    %c0_i32_0 = arith.constant 0 : i32
    %c0_i32_1 = arith.constant 0 : i32
    return %c0_i32, %c0_i32_0 : i32, i32
  }
  func.func @transform_2(%arg0: i32) -> (i32, i32) {
    %c0_i32 = arith.constant 0 : i32
    %c0_i32_0 = arith.constant 0 : i32
    %c0_i32_1 = arith.constant 0 : i32
    return %c0_i32, %c0_i32_0 : i32, i32
  }
  func.func @transform_3(%arg0: i32) -> (i32, i32) {
    %c0_i32 = arith.constant 0 : i32
    %c0_i32_0 = arith.constant 0 : i32
    %c0_i32_1 = arith.constant 0 : i32
    return %c0_i32, %c0_i32_0 : i32, i32
  }
  func.func @transform_4(%arg0: i32) -> (i32, i32) {
    %c0_i32 = arith.constant 0 : i32
    %c0_i32_0 = arith.constant 0 : i32
    %c0_i32_1 = arith.constant 0 : i32
    return %c0_i32, %c0_i32_0 : i32, i32
  }
  func.func @transform_5(%arg0: i32) -> (i32, i32) {
    %c0_i32 = arith.constant 0 : i32
    %c0_i32_0 = arith.constant 0 : i32
    %c0_i32_1 = arith.constant 0 : i32
    return %c0_i32, %c0_i32_0 : i32, i32
  }
  func.func @transform_6(%arg0: i32) -> (i32, i32) {
    %c0_i32 = arith.constant 0 : i32
    %c0_i32_0 = arith.constant 0 : i32
    %c0_i32_1 = arith.constant 0 : i32
    return %c0_i32, %c0_i32_0 : i32, i32
  }
  func.func @transform_7(%arg0: i32) -> (i32, i32) {
    %c0_i32 = arith.constant 0 : i32
    %c0_i32_0 = arith.constant 0 : i32
    return %arg0, %c0_i32 : i32, i32
  }
  func.func @transform_8(%arg0: i32) -> (i32, i32) {
    %c0_i32 = arith.constant 0 : i32
    %c0_i32_0 = arith.constant 0 : i32
    return %arg0, %c0_i32 : i32, i32
  }
}

</mosaic_0001>

<bundles_post_ra>
// kernel: tpu_custom_call.1
= control target key start
LH: loop header
LB: loop body
LE: loop exit
PB: predicated region body
PF: predicated region fallthrough
CT: control target
= control target key end

     0   :  { %vm44_vm0 = vcmask 130048   ;;  %s1357_s0 = inlined_call_operand.vmem [shape: f32[128,16], index: 0, kind: input, shape index: {}]   ;;  %s1358_s3 = inlined_call_operand.vmem [shape: f32[16,16], index: 3, kind: input, shape index: {}]   ;;  %s1359_s4 = inlined_call_operand.vmem [shape: f32[16,16], index: 4, kind: input, shape index: {}]   ;;  %s1360_s1 = inlined_call_operand.vmem [shape: f32[1,16], index: 1, kind: input, shape index: {}]   ;;  %s1361_s2 = inlined_call_operand.vmem [shape: f32[1,16], index: 2, kind: input, shape index: {}]   ;;  %s1362_s5 = inlined_call_operand.vmem [shape: f32[1,16], index: 5, kind: input, shape index: {}]   ;;  %s1363_s6 = inlined_call_operand.vmem [shape: f32[1,16], index: 6, kind: input, shape index: {}]   ;;  %s1364_s7 = inlined_call_operand.vmem [shape: f32[128,16], index: 7, kind: output, shape index: {0}]   ;;  %s1365_s8 = inlined_call_operand.vmem [shape: f32[128,16], index: 8, kind: output, shape index: {1}]  }
   0x1   :  { %v28_v0 = vld [vmem:[%s1357_s0] sm:$0xff]  ;;  %v30_v1 = vld [vmem:[%s1357_s0 + $0x10] sm:$0xff]  ;;  %v29_v2 = vld [vmem:[%s1357_s0 + $0x8] sm:$0xff] }
   0x2   :  { %v45_v3 = vsel %vm44_vm0, %v28_v0, 0.0  ;;  %v51_v4 = vsel %vm44_vm0, %v30_v1, 0.0  ;;  %v31_v5 = vld [vmem:[%s1357_s0 + $0x18] sm:$0xff]  ;;  %v48_v6 = vsel %vm44_vm0, %v29_v2, 0.0  ;;  %v32_v8 = vld [vmem:[%s1357_s0 + $0x20] sm:$0xff]  ;;  %v33_v9 = vld [vmem:[%s1357_s0 + $0x28] sm:$0xff] }
   0x3   :  { %46 = vadd.xlane.f32.xlu0 %v45_v3  ;;  %52 = vadd.xlane.f32.xlu1 %v51_v4  ;;  %v54_v7 = vsel %vm44_vm0, %v31_v5, 0.0  ;;  %v57_v10 = vsel %vm44_vm0, %v32_v8, 0.0  ;;  %v60_v11 = vsel %vm44_vm0, %v33_v9, 0.0  ;;  %v928_v12 = vld [vmem:[%s1357_s0 + $0x30] sm:$0xff]  ;;  %v933_v13 = vld [vmem:[%s1357_s0 + $0x38] sm:$0xff]  ;;  %v942_v16 = vld [vmem:[%s1357_s0 + $0x40] sm:$0xff] }
   0x4   :  { %v63_v14 = vsel %vm44_vm0, %v928_v12, 0.0  ;;  %v66_v15 = vsel %vm44_vm0, %v933_v13, 0.0  ;;  %v947_v17 = vld [vmem:[%s1357_s0 + $0x48] sm:$0xff]  ;;  %v69_v18 = vsel %vm44_vm0, %v942_v16, 0.0  ;;  %v956_v20 = vld [vmem:[%s1357_s0 + $0x50] sm:$0xff]  ;;  %v961_v21 = vld [vmem:[%s1357_s0 + $0x58] sm:$0xff] }
   0x5   :  { %v72_v19 = vsel %vm44_vm0, %v947_v17, 0.0  ;;  %v75_v22 = vsel %vm44_vm0, %v956_v20, 0.0  ;;  %v78_v23 = vsel %vm44_vm0, %v961_v21, 0.0  ;;  %v970_v24 = vld [vmem:[%s1357_s0 + $0x60] sm:$0xff]  ;;  %v975_v25 = vld [vmem:[%s1357_s0 + $0x68] sm:$0xff]  ;;  %v984_v28 = vld [vmem:[%s1357_s0 + $0x70] sm:$0xff] }
   0x6   :  { %v81_v26 = vsel %vm44_vm0, %v970_v24, 0.0  ;;  %v84_v27 = vsel %vm44_vm0, %v975_v25, 0.0  ;;  %v989_v29 = vld [vmem:[%s1357_s0 + $0x78] sm:$0xff]  ;;  %v87_v30 = vsel %vm44_vm0, %v984_v28, 0.0 }
   0x7   :  { %49 = vadd.xlane.f32.xlu0 %v48_v6  ;;  %55 = vadd.xlane.f32.xlu1 %v54_v7  ;;  %v90_v31 = vsel %vm44_vm0, %v989_v29, 0.0 }
   0xb   :  { %58 = vadd.xlane.f32.xlu0 %v57_v10  ;;  %61 = vadd.xlane.f32.xlu1 %v60_v11 }
   0xf   :  { %64 = vadd.xlane.f32.xlu0 %v63_v14  ;;  %67 = vadd.xlane.f32.xlu1 %v66_v15 }
  0x13   :  { %70 = vadd.xlane.f32.xlu0 %v69_v18  ;;  %73 = vadd.xlane.f32.xlu1 %v72_v19 }
  0x17   :  { %76 = vadd.xlane.f32.xlu0 %v75_v22  ;;  %79 = vadd.xlane.f32.xlu1 %v78_v23 }
  0x1b   :  { %82 = vadd.xlane.f32.xlu0 %v81_v26  ;;  %85 = vadd.xlane.f32.xlu1 %v84_v27 }
  0x1f   :  { %88 = vadd.xlane.f32.xlu0 %v87_v30  ;;  %91 = vadd.xlane.f32.xlu1 %v90_v31 }
  0x8c   :  { %v47_v32 = vpop.xlane.xlu0 %46  ;;  %v53_v33 = vpop.xlane.xlu1 %52 }
  0x8d   :  { %v94_v34 = vmul.f32 0.0625, %v47_v32  ;;  %v96_v35 = vmul.f32 0.0625, %v53_v33 }
  0x8f   :  { %v995_v36 = vsub.f32 %v28_v0, %v94_v34  ;;  %v997_v37 = vsub.f32 %v30_v1, %v96_v35 }
  0x90   :  { %v50_v38 = vpop.xlane.xlu0 %49  ;;  %v56_v39 = vpop.xlane.xlu1 %55 }
  0x91   :  { %v95_v40 = vmul.f32 0.0625, %v50_v38  ;;  %v97_v41 = vmul.f32 0.0625, %v56_v39  ;;  %v126_v42 = vmul.f32 %v995_v36, %v995_v36  ;;  %v128_v43 = vmul.f32 %v997_v37, %v997_v37 }
  0x93   :  { %v1003_v44 = vsub.f32 %v29_v2, %v95_v40  ;;  %v1005_v45 = vsub.f32 %v31_v5, %v97_v41  ;;  %v142_v46 = vsel %vm44_vm0, %v126_v42, 0.0  ;;  %v148_v49 = vsel %vm44_vm0, %v128_v43, 0.0 }
  0x94   :  { %143 = vadd.xlane.f32.xlu0 %v142_v46  ;;  %v59_v47 = vpop.xlane.xlu0 %58  ;;  %v62_v48 = vpop.xlane.xlu1 %61 }
  0x95   :  { %v98_v50 = vmul.f32 0.0625, %v59_v47  ;;  %v99_v51 = vmul.f32 0.0625, %v62_v48  ;;  %v127_v52 = vmul.f32 %v1003_v44, %v1003_v44  ;;  %v129_v53 = vmul.f32 %v1005_v45, %v1005_v45 }
  0x97   :  { %v1013_v54 = vsub.f32 %v32_v8, %v98_v50  ;;  %v1015_v55 = vsub.f32 %v33_v9, %v99_v51  ;;  %v145_v56 = vsel %vm44_vm0, %v127_v52, 0.0  ;;  %v151_v59 = vsel %vm44_vm0, %v129_v53, 0.0  ;;  %v303_v53 = vld [vmem:[%s1359_s4 + $0x8] sm:$0xff] }
  0x98   :  { %149 = vadd.xlane.f32.xlu0 %v148_v49  ;;  %146 = vadd.xlane.f32.xlu1 %v145_v56  ;;  %v65_v57 = vpop.xlane.xlu0 %64  ;;  %v68_v58 = vpop.xlane.xlu1 %67  ;;  %v300_v56 = vld [vmem:[%s1358_s3] sm:$0xff] }
  0x99   :  { %v100_v60 = vmul.f32 0.0625, %v65_v57  ;;  %v101_v61 = vmul.f32 0.0625, %v68_v58  ;;  %v130_v62 = vmul.f32 %v1013_v54, %v1013_v54  ;;  %v131_v63 = vmul.f32 %v1015_v55, %v1015_v55  ;;  %796 = vmatprep.subr.mxu1 %v303_v53  ;;  %v302_v57 = vld [vmem:[%s1359_s4] sm:$0xff] }
  0x9a   :  { %797 = vmatpush3.msra.mxu1 %v303_v53 }
  0x9b   :  { %v1024_v0 = vsub.f32 %v928_v12, %v100_v60  ;;  %v1027_v1 = vsub.f32 %v933_v13, %v101_v61  ;;  %v154_v2 = vsel %vm44_vm0, %v130_v62, 0.0  ;;  %v157_v5 = vsel %vm44_vm0, %v131_v63, 0.0  ;;  %798 = vmatprep.subr.mxu1 %v302_v57 }
  0x9c   :  { %152 = vadd.xlane.f32.xlu1 %v151_v59  ;;  %155 = vadd.xlane.f32.xlu0 %v154_v2  ;;  %v71_v3 = vpop.xlane.xlu0 %70  ;;  %v74_v4 = vpop.xlane.xlu1 %73 }
  0x9d   :  { %v102_v6 = vmul.f32 0.0625, %v71_v3  ;;  %v103_v7 = vmul.f32 0.0625, %v74_v4  ;;  %v132_v8 = vmul.f32 %v1024_v0, %v1024_v0  ;;  %v133_v9 = vmul.f32 %v1027_v1, %v1027_v1  ;;  %799 = vmatpush3.msra.mxu1 %v302_v57 }
  0x9f   :  { %v1036_v10 = vsub.f32 %v942_v16, %v102_v6  ;;  %v1039_v11 = vsub.f32 %v947_v17, %v103_v7  ;;  %v160_v12 = vsel %vm44_vm0, %v132_v8, 0.0  ;;  %v163_v15 = vsel %vm44_vm0, %v133_v9, 0.0 }
  0xa0   :  { %158 = vadd.xlane.f32.xlu1 %v157_v5  ;;  %161 = vadd.xlane.f32.xlu0 %v160_v12  ;;  %v77_v13 = vpop.xlane.xlu0 %76  ;;  %v80_v14 = vpop.xlane.xlu1 %79 }
  0xa1   :  { %v104_v18 = vmul.f32 0.0625, %v77_v13  ;;  %v105_v19 = vmul.f32 0.0625, %v80_v14  ;;  %v134_v22 = vmul.f32 %v1036_v10, %v1036_v10  ;;  %v135_v16 = vmul.f32 %v1039_v11, %v1039_v11 }
  0xa3   :  { %v1048_v23 = vsub.f32 %v956_v20, %v104_v18  ;;  %v1051_v17 = vsub.f32 %v961_v21, %v105_v19  ;;  %v166_v26 = vsel %vm44_vm0, %v134_v22, 0.0  ;;  %v169_v31 = vsel %vm44_vm0, %v135_v16, 0.0 }
  0xa4   :  { %164 = vadd.xlane.f32.xlu1 %v163_v15  ;;  %167 = vadd.xlane.f32.xlu0 %v166_v26  ;;  %v83_v27 = vpop.xlane.xlu0 %82  ;;  %v86_v30 = vpop.xlane.xlu1 %85 }
  0xa5   :  { %v106_v32 = vmul.f32 0.0625, %v83_v27  ;;  %v107_v33 = vmul.f32 0.0625, %v86_v30  ;;  %v136_v34 = vmul.f32 %v1048_v23, %v1048_v23  ;;  %v137_v20 = vmul.f32 %v1051_v17, %v1051_v17 }
  0xa7   :  { %v1060_v35 = vsub.f32 %v970_v24, %v106_v32  ;;  %v1063_v21 = vsub.f32 %v975_v25, %v107_v33  ;;  %v172_v38 = vsel %vm44_vm0, %v136_v34, 0.0  ;;  %v175_v41 = vsel %vm44_vm0, %v137_v20, 0.0  ;;  %v1100_v32 = vld [vmem:[%s1360_s1] ss:$0 sm:$0xff] }
  0xa8   :  { %170 = vadd.xlane.f32.xlu1 %v169_v31  ;;  %173 = vadd.xlane.f32.xlu0 %v172_v38  ;;  %v89_v39 = vpop.xlane.xlu0 %88  ;;  %v92_v40 = vpop.xlane.xlu1 %91 }
  0xa9   :  { %v108_v42 = vmul.f32 0.0625, %v89_v39  ;;  %v109_v43 = vmul.f32 0.0625, %v92_v40  ;;  %v138_v46 = vmul.f32 %v1060_v35, %v1060_v35  ;;  %v139_v24 = vmul.f32 %v1063_v21, %v1063_v21  ;;  %v1106_v40 = vld [vmem:[%s1361_s2] ss:$0 sm:$0xff] }
  0xab   :  { %v1072_v47 = vsub.f32 %v984_v28, %v108_v42  ;;  %v1075_v25 = vsub.f32 %v989_v29, %v109_v43  ;;  %v178_v48 = vsel %vm44_vm0, %v138_v46, 0.0  ;;  %v181_v49 = vsel %vm44_vm0, %v139_v24, 0.0  ;;  %v301_v29 = vld [vmem:[%s1358_s3 + $0x8] sm:$0xff] }
  0xac   :  { %176 = vadd.xlane.f32.xlu1 %v175_v41  ;;  %179 = vadd.xlane.f32.xlu0 %v178_v48 }
  0xad   :  { %v140_v50 = vmul.f32 %v1072_v47, %v1072_v47  ;;  %v141_v51 = vmul.f32 %v1075_v25, %v1075_v25  ;;  %768 = vmatprep.subr.mxu0 %v301_v29 }
  0xae   :  { %769 = vmatpush3.msra.mxu0 %v301_v29 }
  0xaf   :  { %v184_v52 = vsel %vm44_vm0, %v140_v50, 0.0  ;;  %v187_v28 = vsel %vm44_vm0, %v141_v51, 0.0  ;;  %770 = vmatprep.subr.mxu0 %v300_v56 }
  0xb0   :  { %182 = vadd.xlane.f32.xlu1 %v181_v49  ;;  %185 = vadd.xlane.f32.xlu0 %v184_v52 }
  0xb1   :  { %771 = vmatpush3.msra.mxu0 %v300_v56 }
  0xb4   :  { %188 = vadd.xlane.f32.xlu1 %v187_v28 }
 0x11d   :  { %v144_v58 = vpop.xlane.xlu0 %143 }
 0x11e   :  { %v190_v59 = vmul.f32 0.0625, %v144_v58 }
 0x120   :  { %v206_v60 = vadd.f32 1e-05, %v190_v59 }
 0x121   :  { %v147_v61 = vpop.xlane.xlu1 %146  ;;  %v150_v62 = vpop.xlane.xlu0 %149 }
 0x122   :  { %824 = vrsqrt.f32 %v206_v60  ;;  %v191_v63 = vmul.f32 0.0625, %v147_v61  ;;  %v192_v2 = vmul.f32 0.0625, %v150_v62 }
 0x124   :  { %v207_v3 = vadd.f32 1e-05, %v191_v63  ;;  %v208_v4 = vadd.f32 1e-05, %v192_v2 }
 0x125   :  { %v153_v5 = vpop.xlane.xlu1 %152  ;;  %v156_v6 = vpop.xlane.xlu0 %155 }
 0x126   :  { %826 = vrsqrt.f32 %v207_v3  ;;  %v193_v7 = vmul.f32 0.0625, %v153_v5  ;;  %v194_v8 = vmul.f32 0.0625, %v156_v6 }
 0x127   :  { %828 = vrsqrt.f32 %v208_v4 }
 0x128   :  { %v209_v9 = vadd.f32 1e-05, %v193_v7  ;;  %v210_v12 = vadd.f32 1e-05, %v194_v8 }
 0x129   :  { %v159_v13 = vpop.xlane.xlu1 %158  ;;  %v162_v14 = vpop.xlane.xlu0 %161 }
 0x12a   :  { %830 = vrsqrt.f32 %v209_v9  ;;  %v195_v15 = vmul.f32 0.0625, %v159_v13  ;;  %v196_v18 = vmul.f32 0.0625, %v162_v14 }
 0x12b   :  { %832 = vrsqrt.f32 %v210_v12 }
 0x12c   :  { %v211_v19 = vadd.f32 1e-05, %v195_v15  ;;  %v212_v22 = vadd.f32 1e-05, %v196_v18 }
 0x12d   :  { %v165_v16 = vpop.xlane.xlu1 %164  ;;  %v168_v26 = vpop.xlane.xlu0 %167 }
 0x12e   :  { %834 = vrsqrt.f32 %v211_v19  ;;  %v197_v27 = vmul.f32 0.0625, %v165_v16  ;;  %v198_v30 = vmul.f32 0.0625, %v168_v26 }
 0x12f   :  { %v825_v31 = vpop.eup %824  ;;  %836 = vrsqrt.f32 %v212_v22 }
 0x130   :  { %v213_v33 = vadd.f32 1e-05, %v197_v27  ;;  %v214_v34 = vadd.f32 1e-05, %v198_v30  ;;  %v238_v20 = vmul.f32 %v825_v31, %v995_v36 }
 0x131   :  { %v171_v38 = vpop.xlane.xlu1 %170  ;;  %v174_v39 = vpop.xlane.xlu0 %173 }
 0x132   :  { %838 = vrsqrt.f32 %v213_v33  ;;  %v199_v41 = vmul.f32 0.0625, %v171_v38  ;;  %v200_v42 = vmul.f32 0.0625, %v174_v39  ;;  %v261_v43 = vmul.f32 %v1100_v32, %v238_v20 }
 0x133   :  { %v827_v46 = vpop.eup %826  ;;  %840 = vrsqrt.f32 %v214_v34 }
 0x134   :  { %v829_v24 = vpop.eup %828  ;;  %v215_v48 = vadd.f32 1e-05, %v199_v41  ;;  %v216_v49 = vadd.f32 1e-05, %v200_v42  ;;  %v284_v50 = vadd.f32 %v1106_v40, %v261_v43  ;;  %v239_v36 = vmul.f32 %v827_v46, %v1003_v44 }
 0x135   :  { %v177_v51 = vpop.xlane.xlu1 %176  ;;  %v180_v52 = vpop.xlane.xlu0 %179  ;;  %v240_v28 = vmul.f32 %v829_v24, %v997_v37 }
 0x136   :  { %842 = vrsqrt.f32 %v215_v48  ;;  %v201_v29 = vmul.f32 0.0625, %v177_v51  ;;  %v202_v53 = vmul.f32 0.0625, %v180_v52  ;;  %772 = vmatprep.mubr.msk.f32.mxu0 %vm44_vm0, %v284_v50  ;;  %800 = vmatprep.mubr.msk.f32.mxu1 %vm44_vm0, %v284_v50  ;;  %v262_v56 = vmul.f32 %v1100_v32, %v239_v36 }
 0x137   :  { %v831_v57 = vpop.eup %830  ;;  %844 = vrsqrt.f32 %v216_v49  ;;  %v263_v58 = vmul.f32 %v1100_v32, %v240_v28 }
 0x138   :  { %v833_v59 = vpop.eup %832  ;;  %v217_v60 = vadd.f32 1e-05, %v201_v29  ;;  %v218_v44 = vadd.f32 1e-05, %v202_v53  ;;  %v285_v61 = vadd.f32 %v1106_v40, %v262_v56  ;;  %v241_v37 = vmul.f32 %v831_v57, %v1005_v45 }
 0x139   :  { %v183_v62 = vpop.xlane.xlu1 %182  ;;  %v186_v63 = vpop.xlane.xlu0 %185  ;;  %v286_v2 = vadd.f32 %v1106_v40, %v263_v58  ;;  %v242_v3 = vmul.f32 %v833_v59, %v1013_v54 }
 0x13a   :  { %846 = vrsqrt.f32 %v217_v60  ;;  %v203_v4 = vmul.f32 0.0625, %v183_v62  ;;  %v204_v5 = vmul.f32 0.0625, %v186_v63  ;;  %773 = vmatmul.mubr.msk.f32.vlgmr.msra.gmra.mxu0 %vm44_vm0, %v285_v61  ;;  %801 = vmatmul.mubr.msk.f32.vlgmr.msra.gmra.mxu1 %vm44_vm0, %v285_v61  ;;  %v264_v6 = vmul.f32 %v1100_v32, %v241_v37  ;;  %v1195_v61 = vld [vmem:[%s1363_s6] ss:$0 sm:$0xff] }
 0x13b   :  { %v835_v7 = vpop.eup %834  ;;  %848 = vrsqrt.f32 %v218_v44  ;;  %775 = vmatprep.mubr.msk.f32.mxu0 %vm44_vm0, %v286_v2  ;;  %803 = vmatprep.mubr.msk.f32.mxu1 %vm44_vm0, %v286_v2  ;;  %v265_v45 = vmul.f32 %v1100_v32, %v242_v3 }
 0x13c   :  { %v837_v8 = vpop.eup %836  ;;  %v219_v9 = vadd.f32 1e-05, %v203_v4  ;;  %v220_v54 = vadd.f32 1e-05, %v204_v5  ;;  %v287_v12 = vadd.f32 %v1106_v40, %v264_v6  ;;  %v243_v13 = vmul.f32 %v835_v7, %v1015_v55 }
 0x13d   :  { %v189_v14 = vpop.xlane.xlu1 %188  ;;  %v288_v15 = vadd.f32 %v1106_v40, %v265_v45  ;;  %v244_v18 = vmul.f32 %v837_v8, %v1024_v0 }
 0x13e   :  { %850 = vrsqrt.f32 %v219_v9  ;;  %v205_v19 = vmul.f32 0.0625, %v189_v14  ;;  %776 = vmatmul.mubr.msk.f32.gmra.mxu0 %vm44_vm0, %v287_v12  ;;  %804 = vmatmul.mubr.msk.f32.gmra.mxu1 %vm44_vm0, %v287_v12  ;;  %v266_v22 = vmul.f32 %v1100_v32, %v243_v13 }
 0x13f   :  { %v839_v16 = vpop.eup %838  ;;  %852 = vrsqrt.f32 %v220_v54  ;;  %778 = vmatprep.mubr.msk.f32.mxu0 %vm44_vm0, %v288_v15  ;;  %806 = vmatprep.mubr.msk.f32.mxu1 %vm44_vm0, %v288_v15  ;;  %v267_v55 = vmul.f32 %v1100_v32, %v244_v18 }
 0x140   :  { %v841_v26 = vpop.eup %840  ;;  %v221_v27 = vadd.f32 1e-05, %v205_v19  ;;  %v289_v0 = vadd.f32 %v1106_v40, %v266_v22  ;;  %v245_v30 = vmul.f32 %v839_v16, %v1027_v1 }
 0x141   :  { %v290_v31 = vadd.f32 %v1106_v40, %v267_v55  ;;  %v246_v33 = vmul.f32 %v841_v26, %v1036_v10 }
 0x142   :  { %854 = vrsqrt.f32 %v221_v27  ;;  %779 = vmatmul.mubr.msk.f32.gmra.mxu0 %vm44_vm0, %v289_v0  ;;  %807 = vmatmul.mubr.msk.f32.gmra.mxu1 %vm44_vm0, %v289_v0  ;;  %v268_v34 = vmul.f32 %v1100_v32, %v245_v30 }
 0x143   :  { %v843_v20 = vpop.eup %842  ;;  %781 = vmatprep.mubr.msk.f32.mxu0 %vm44_vm0, %v290_v31  ;;  %809 = vmatprep.mubr.msk.f32.mxu1 %vm44_vm0, %v290_v31  ;;  %v269_v38 = vmul.f32 %v1100_v32, %v246_v33 }
 0x144   :  { %v845_v39 = vpop.eup %844  ;;  %v291_v1 = vadd.f32 %v1106_v40, %v268_v34  ;;  %v247_v41 = vmul.f32 %v843_v20, %v1039_v11 }
 0x145   :  { %v292_v10 = vadd.f32 %v1106_v40, %v269_v38  ;;  %v248_v42 = vmul.f32 %v845_v39, %v1048_v23 }
 0x146   :  { %782 = vmatmul.mubr.msk.f32.gmra.mxu0 %vm44_vm0, %v291_v1  ;;  %810 = vmatmul.mubr.msk.f32.gmra.mxu1 %vm44_vm0, %v291_v1  ;;  %v270_v43 = vmul.f32 %v1100_v32, %v247_v41 }
 0x147   :  { %v847_v46 = vpop.eup %846  ;;  %784 = vmatprep.mubr.msk.f32.mxu0 %vm44_vm0, %v292_v10  ;;  %812 = vmatprep.mubr.msk.f32.mxu1 %vm44_vm0, %v292_v10  ;;  %v271_v24 = vmul.f32 %v1100_v32, %v248_v42 }
 0x148   :  { %v849_v48 = vpop.eup %848  ;;  %v293_v11 = vadd.f32 %v1106_v40, %v270_v43  ;;  %v249_v49 = vmul.f32 %v847_v46, %v1051_v17 }
 0x149   :  { %v294_v23 = vadd.f32 %v1106_v40, %v271_v24  ;;  %v250_v50 = vmul.f32 %v849_v48, %v1060_v35 }
 0x14a   :  { %785 = vmatmul.mubr.msk.f32.gmra.mxu0 %vm44_vm0, %v293_v11  ;;  %813 = vmatmul.mubr.msk.f32.gmra.mxu1 %vm44_vm0, %v293_v11  ;;  %v272_v36 = vmul.f32 %v1100_v32, %v249_v49 }
 0x14b   :  { %v851_v51 = vpop.eup %850  ;;  %787 = vmatprep.mubr.msk.f32.mxu0 %vm44_vm0, %v294_v23  ;;  %815 = vmatprep.mubr.msk.f32.mxu1 %vm44_vm0, %v294_v23  ;;  %v273_v52 = vmul.f32 %v1100_v32, %v250_v50 }
 0x14c   :  { %v853_v28 = vpop.eup %852  ;;  %v295_v17 = vadd.f32 %v1106_v40, %v272_v36  ;;  %v251_v29 = vmul.f32 %v851_v51, %v1063_v21 }
 0x14d   :  { %v296_v35 = vadd.f32 %v1106_v40, %v273_v52  ;;  %v252_v53 = vmul.f32 %v853_v28, %v1072_v47 }
 0x14e   :  { %788 = vmatmul.mubr.msk.f32.gmra.mxu0 %vm44_vm0, %v295_v17  ;;  %816 = vmatmul.mubr.msk.f32.gmra.mxu1 %vm44_vm0, %v295_v17  ;;  %v274_v56 = vmul.f32 %v1100_v32, %v251_v29 }
 0x14f   :  { %v855_v57 = vpop.eup %854  ;;  %790 = vmatprep.mubr.msk.f32.mxu0 %vm44_vm0, %v296_v35  ;;  %818 = vmatprep.mubr.msk.f32.mxu1 %vm44_vm0, %v296_v35  ;;  %v275_v58 = vmul.f32 %v1100_v32, %v252_v53 }
 0x150   :  { %v297_v59 = vadd.f32 %v1106_v40, %v274_v56  ;;  %v253_v21 = vmul.f32 %v855_v57, %v1075_v25  ;;  %v1190_v25 = vld [vmem:[%s1362_s5] ss:$0 sm:$0xff] }
 0x151   :  { %v298_v60 = vadd.f32 %v1106_v40, %v275_v58 }
 0x152   :  { %791 = vmatmul.mubr.msk.f32.gmra.mxu0 %vm44_vm0, %v297_v59  ;;  %819 = vmatmul.mubr.msk.f32.gmra.mxu1 %vm44_vm0, %v297_v59  ;;  %v276_v47 = vmul.f32 %v1100_v32, %v253_v21 }
 0x153   :  { %793 = vmatprep.mubr.msk.f32.mxu0 %vm44_vm0, %v298_v60  ;;  %821 = vmatprep.mubr.msk.f32.mxu1 %vm44_vm0, %v298_v60 }
 0x154   :  { %v299_v44 = vadd.f32 %v1106_v40, %v276_v47 }
 0x156   :  { %794 = vmatmul.mubr.msk.f32.gmra.mxu0 %vm44_vm0, %v299_v44  ;;  %822 = vmatmul.mubr.msk.f32.gmra.mxu1 %vm44_vm0, %v299_v44 }
 0x1fa   :  { %v774_v32 = vpop.f32.mrf.mxu0  ;;  %v802_v37 = vpop.f32.mrf.mxu1 }
 0x1fb   :  { %v431_v62 = vadd.f32 %v774_v32, %v1190_v25  ;;  %v599_v40 = vadd.f32 %v802_v37, %v1195_v61 }
 0x1fc   :  { %v425_v63 = vpop.f32.mrf.mxu0  ;;  %v593_v2 = vpop.f32.mrf.mxu1 }
 0x1fd   :  { %505 = vst.msk [vmem:[%s1364_s7 + $0x8] sm:$0xff] %vm44_vm0, %v431_v62  ;;  %673 = vst.msk [vmem:[%s1365_s8 + $0x8] sm:$0xff] %vm44_vm0, %v599_v40  ;;  %v426_v3 = vadd.f32 %v1190_v25, %v425_v63  ;;  %v594_v4 = vadd.f32 %v1195_v61, %v593_v2 }
 0x1fe   :  { %v777_v5 = vpop.f32.mrf.mxu0  ;;  %v805_v6 = vpop.f32.mrf.mxu1 }
 0x1ff   :  { %504 = vst.msk [vmem:[%s1364_s7] sm:$0xff] %vm44_vm0, %v426_v3  ;;  %672 = vst.msk [vmem:[%s1365_s8] sm:$0xff] %vm44_vm0, %v594_v4  ;;  %v441_v7 = vadd.f32 %v777_v5, %v1190_v25  ;;  %v609_v45 = vadd.f32 %v805_v6, %v1195_v61 }
 0x200   :  { %v435_v8 = vpop.f32.mrf.mxu0  ;;  %v603_v9 = vpop.f32.mrf.mxu1 }
 0x201   :  { %507 = vst.msk [vmem:[%s1364_s7 + $0x18] sm:$0xff] %vm44_vm0, %v441_v7  ;;  %675 = vst.msk [vmem:[%s1365_s8 + $0x18] sm:$0xff] %vm44_vm0, %v609_v45  ;;  %v436_v54 = vadd.f32 %v1190_v25, %v435_v8  ;;  %v604_v12 = vadd.f32 %v1195_v61, %v603_v9 }
 0x202   :  { %v780_v13 = vpop.f32.mrf.mxu0  ;;  %v808_v14 = vpop.f32.mrf.mxu1 }
 0x203   :  { %506 = vst.msk [vmem:[%s1364_s7 + $0x10] sm:$0xff] %vm44_vm0, %v436_v54  ;;  %674 = vst.msk [vmem:[%s1365_s8 + $0x10] sm:$0xff] %vm44_vm0, %v604_v12  ;;  %v451_v15 = vadd.f32 %v780_v13, %v1190_v25  ;;  %v619_v18 = vadd.f32 %v808_v14, %v1195_v61 }
 0x204   :  { %v445_v19 = vpop.f32.mrf.mxu0  ;;  %v613_v22 = vpop.f32.mrf.mxu1 }
 0x205   :  { %509 = vst.msk [vmem:[%s1364_s7 + $0x28] sm:$0xff] %vm44_vm0, %v451_v15  ;;  %677 = vst.msk [vmem:[%s1365_s8 + $0x28] sm:$0xff] %vm44_vm0, %v619_v18  ;;  %v446_v16 = vadd.f32 %v1190_v25, %v445_v19  ;;  %v614_v55 = vadd.f32 %v1195_v61, %v613_v22 }
 0x206   :  { %v783_v26 = vpop.f32.mrf.mxu0  ;;  %v811_v27 = vpop.f32.mrf.mxu1 }
 0x207   :  { %508 = vst.msk [vmem:[%s1364_s7 + $0x20] sm:$0xff] %vm44_vm0, %v446_v16  ;;  %676 = vst.msk [vmem:[%s1365_s8 + $0x20] sm:$0xff] %vm44_vm0, %v614_v55  ;;  %v461_v0 = vadd.f32 %v783_v26, %v1190_v25  ;;  %v629_v30 = vadd.f32 %v811_v27, %v1195_v61 }
 0x208   :  { %v455_v31 = vpop.f32.mrf.mxu0  ;;  %v623_v33 = vpop.f32.mrf.mxu1 }
 0x209   :  { %511 = vst.msk [vmem:[%s1364_s7 + $0x38] sm:$0xff] %vm44_vm0, %v461_v0  ;;  %679 = vst.msk [vmem:[%s1365_s8 + $0x38] sm:$0xff] %vm44_vm0, %v629_v30  ;;  %v456_v34 = vadd.f32 %v1190_v25, %v455_v31  ;;  %v624_v20 = vadd.f32 %v1195_v61, %v623_v33 }
 0x20a   :  { %v786_v38 = vpop.f32.mrf.mxu0  ;;  %v814_v39 = vpop.f32.mrf.mxu1 }
 0x20b   :  { %510 = vst.msk [vmem:[%s1364_s7 + $0x30] sm:$0xff] %vm44_vm0, %v456_v34  ;;  %678 = vst.msk [vmem:[%s1365_s8 + $0x30] sm:$0xff] %vm44_vm0, %v624_v20  ;;  %v471_v1 = vadd.f32 %v786_v38, %v1190_v25  ;;  %v639_v41 = vadd.f32 %v814_v39, %v1195_v61 }
 0x20c   :  { %v465_v10 = vpop.f32.mrf.mxu0  ;;  %v633_v42 = vpop.f32.mrf.mxu1 }
 0x20d   :  { %513 = vst.msk [vmem:[%s1364_s7 + $0x48] sm:$0xff] %vm44_vm0, %v471_v1  ;;  %681 = vst.msk [vmem:[%s1365_s8 + $0x48] sm:$0xff] %vm44_vm0, %v639_v41  ;;  %v466_v43 = vadd.f32 %v1190_v25, %v465_v10  ;;  %v634_v46 = vadd.f32 %v1195_v61, %v633_v42 }
 0x20e   :  { %v789_v24 = vpop.f32.mrf.mxu0  ;;  %v817_v48 = vpop.f32.mrf.mxu1 }
 0x20f   :  { %512 = vst.msk [vmem:[%s1364_s7 + $0x40] sm:$0xff] %vm44_vm0, %v466_v43  ;;  %680 = vst.msk [vmem:[%s1365_s8 + $0x40] sm:$0xff] %vm44_vm0, %v634_v46  ;;  %v481_v11 = vadd.f32 %v789_v24, %v1190_v25  ;;  %v649_v49 = vadd.f32 %v817_v48, %v1195_v61 }
 0x210   :  { %v475_v23 = vpop.f32.mrf.mxu0  ;;  %v643_v50 = vpop.f32.mrf.mxu1 }
 0x211   :  { %515 = vst.msk [vmem:[%s1364_s7 + $0x58] sm:$0xff] %vm44_vm0, %v481_v11  ;;  %683 = vst.msk [vmem:[%s1365_s8 + $0x58] sm:$0xff] %vm44_vm0, %v649_v49  ;;  %v476_v36 = vadd.f32 %v1190_v25, %v475_v23  ;;  %v644_v51 = vadd.f32 %v1195_v61, %v643_v50 }
 0x212   :  { %v792_v52 = vpop.f32.mrf.mxu0  ;;  %v820_v28 = vpop.f32.mrf.mxu1 }
 0x213   :  { %514 = vst.msk [vmem:[%s1364_s7 + $0x50] sm:$0xff] %vm44_vm0, %v476_v36  ;;  %682 = vst.msk [vmem:[%s1365_s8 + $0x50] sm:$0xff] %vm44_vm0, %v644_v51  ;;  %v491_v17 = vadd.f32 %v792_v52, %v1190_v25  ;;  %v659_v29 = vadd.f32 %v820_v28, %v1195_v61 }
 0x214   :  { %v485_v35 = vpop.f32.mrf.mxu0  ;;  %v653_v53 = vpop.f32.mrf.mxu1 }
 0x215   :  { %517 = vst.msk [vmem:[%s1364_s7 + $0x68] sm:$0xff] %vm44_vm0, %v491_v17  ;;  %685 = vst.msk [vmem:[%s1365_s8 + $0x68] sm:$0xff] %vm44_vm0, %v659_v29  ;;  %v486_v56 = vadd.f32 %v1190_v25, %v485_v35  ;;  %v654_v57 = vadd.f32 %v1195_v61, %v653_v53 }
 0x216   :  { %v795_v58 = vpop.f32.mrf.mxu0  ;;  %v823_v59 = vpop.f32.mrf.mxu1 }
 0x217   :  { %516 = vst.msk [vmem:[%s1364_s7 + $0x60] sm:$0xff] %vm44_vm0, %v486_v56  ;;  %684 = vst.msk [vmem:[%s1365_s8 + $0x60] sm:$0xff] %vm44_vm0, %v654_v57  ;;  %v501_v21 = vadd.f32 %v795_v58, %v1190_v25  ;;  %v669_v60 = vadd.f32 %v823_v59, %v1195_v61 }
 0x218   :  { %v495_v47 = vpop.f32.mrf.mxu0  ;;  %v663_v44 = vpop.f32.mrf.mxu1 }
 0x219   :  { %519 = vst.msk [vmem:[%s1364_s7 + $0x78] sm:$0xff] %vm44_vm0, %v501_v21  ;;  %687 = vst.msk [vmem:[%s1365_s8 + $0x78] sm:$0xff] %vm44_vm0, %v669_v60  ;;  %v496_v32 = vadd.f32 %v1190_v25, %v495_v47  ;;  %v664_v37 = vadd.f32 %v1195_v61, %v663_v44 }
 0x21b   :  { %518 = vst.msk [vmem:[%s1364_s7 + $0x70] sm:$0xff] %vm44_vm0, %v496_v32  ;;  %686 = vst.msk [vmem:[%s1365_s8 + $0x70] sm:$0xff] %vm44_vm0, %v664_v37 }

</bundles_post_ra>
